<compile_context>
chip_gen: v7x
topology: tpu7x:2x2x1
jax: 0.10.0
libtpu: 0.0.40
codegen_flags: <defaults>
</compile_context>

<pallas_src>
import functools

import jax
import jax.numpy as jnp
import numpy as np
from jax import lax
from jax.experimental import pallas as pl
from jax.experimental.pallas import tpu as pltpu


def _round_up(x, m):
    return ((x + m - 1) // m) * m


def _distance_kernel(pb_r_ref, pb_c_ref, out_ref, cnt_ref, *, cl2, cu2):
    """One (TM, TN) tile of the masked distance matrix + per-row counts."""
    tm, tn = out_ref.shape

    # Row side: packed (TM, 4) = [x, y, z, batch-id-as-f32] -> (TM, 1) columns.
    xi = pb_r_ref[:, 0:1]
    yi = pb_r_ref[:, 1:2]
    zi = pb_r_ref[:, 2:3]
    bi = pb_r_ref[:, 3:4]
    # Column side was pre-transposed in the wrapper: (4, TN) lane-dense rows,
    # so no in-kernel cross-lane transpose is needed.
    xj = pb_c_ref[0:1, :]
    yj = pb_c_ref[1:2, :]
    zj = pb_c_ref[2:3, :]
    bj = pb_c_ref[3:4, :]

    dx = xi - xj                              # (TM, TN)
    dy = yi - yj
    dz = zi - zj
    d2 = dx * dx + dy * dy + dz * dz          # squared distance, f32

    # Mask on squared distance (VALU); sqrt (EUP) overlaps with it.
    adj = (bi == bj) & (d2 <= cu2)
    if cl2 > 0.0:                             # trace-time specialization
        adj = adj & (d2 >= cl2)

    dist = jnp.sqrt(d2)

    # Per-row neighbor-count accumulator: resident across the column axis.
    @pl.when(pl.program_id(1) == 0)
    def _():
        cnt_ref[...] = jnp.zeros_like(cnt_ref)

    row0 = pl.program_id(0) * tm
    col0 = pl.program_id(1) * tn
    touches_diag = (row0 < col0 + tn) & (col0 < row0 + tm)

    @pl.when(touches_diag)
    def _():
        # loop=False -> drop self edges; only tiles crossing the diagonal pay.
        ri = row0 + lax.broadcasted_iota(jnp.int32, (tm, 1), 0)
        cj = col0 + lax.broadcasted_iota(jnp.int32, (1, tn), 1)
        a = adj & (ri != cj)
        out_ref[...] = jnp.where(a, dist, jnp.float32(-1.0))
        cnt_ref[...] += jnp.sum(a.astype(jnp.float32), axis=1, keepdims=True)

    @pl.when(jnp.logical_not(touches_diag))
    def _():
        out_ref[...] = jnp.where(adj, dist, jnp.float32(-1.0))
        cnt_ref[...] += jnp.sum(adj.astype(jnp.float32), axis=1, keepdims=True)


def pairwise_distance_pallas(pos, batch, cutoff_lower, cutoff_upper):
    """Returns ((n, n) masked distances, (n,) int32 neighbor counts).

    dist[i, j] = |pos_i - pos_j| if (i, j) is an edge, else -1.0.
    """
    n = pos.shape[0]

    # Padding limited to one 128-wide stripe; pick (8,128)-aligned tiles that
    # divide npad exactly.  TN is kept lane-wide for large HBM store bursts.
    npad = _round_up(n, 128)
    tm = 256 if npad % 256 == 0 else 128
    tn = 128
    for cand in (1024, 512, 256):
        if npad % cand == 0:
            tn = cand
            break
    grid = (npad // tm, npad // tn)

    posf = pos.astype(jnp.float32)
    batf = batch.astype(jnp.float32)
    # Row pads get batch id -1, column pads -2: pad-pad pairs never match.
    pb_r = jnp.full((npad, 4), -1.0, jnp.float32)
    pb_r = pb_r.at[:n, :3].set(posf).at[:n, 3].set(batf)
    pb_c = jnp.full((npad, 4), -2.0, jnp.float32)
    pb_c = pb_c.at[:n, :3].set(posf).at[:n, 3].set(batf)
    pb_c = pb_c.T                              # (4, npad) column side

    kernel = functools.partial(
        _distance_kernel,
        cl2=float(cutoff_lower) ** 2,
        cu2=float(cutoff_upper) ** 2,
    )

    dist, cnt = pl.pallas_call(
        kernel,
        out_shape=(jax.ShapeDtypeStruct((npad, npad), jnp.float32),
                   jax.ShapeDtypeStruct((npad, 1), jnp.float32)),
        grid=grid,
        in_specs=[
            pl.BlockSpec((tm, 4), lambda i, j: (i, 0)),   # packed rows
            pl.BlockSpec((4, tn), lambda i, j: (0, j)),   # packed cols (pre-T)
        ],
        out_specs=(
            pl.BlockSpec((tm, tn), lambda i, j: (i, j)),  # masked distances
            pl.BlockSpec((tm, 1), lambda i, j: (i, 0)),   # per-row counts
        ),
        compiler_params=pltpu.CompilerParams(
            # Row axis sharded across TensorCores (v7x megacore); column axis
            # is the counts-reduction axis, hence 'arbitrary'.
            dimension_semantics=("parallel", "arbitrary")),
    )(pb_r, pb_c)

    return dist[:n, :n], cnt[:n, 0].astype(jnp.int32)


def distance_forward(pos, batch, *, cutoff_lower, cutoff_upper,
                     max_num_neighbors=32):
    """Dense-padded equivalent of Distance.forward (loop=False, return_vecs=False).

    Returns:
      edge_index : (2, N * max_num_neighbors) int32, padded with -1
      edge_weight: (N * max_num_neighbors,)   float32, padded with 0.0
      edge_vec   : None (return_vecs=False in the reference module)
      counts     : (N,) int32 number of real neighbors per atom
    """
    n = pos.shape[0]
    k = max_num_neighbors
    k_eff = min(k, n)

    dist, counts = pairwise_distance_pallas(pos, batch, cutoff_lower,
                                            cutoff_upper)

    # Keep up to K neighbors per row, lowest column indices first.
    col = jnp.arange(n, dtype=jnp.int32)
    key = jnp.where(dist >= 0.0, n - col[None, :], -1)     # edge & small col -> big key
    _, nbr_idx = jax.lax.top_k(key, k_eff)                  # (N, k_eff)
    if k_eff < k:
        nbr_idx = jnp.pad(nbr_idx, ((0, 0), (0, k - k_eff)))
    nbr_idx = nbr_idx.astype(jnp.int32)

    valid = jnp.arange(k, dtype=jnp.int32)[None, :] < counts[:, None]

    src = jnp.broadcast_to(jnp.arange(n, dtype=jnp.int32)[:, None], (n, k))
    edge_i = jnp.where(valid, src, -1).reshape(-1)          # centers
    edge_j = jnp.where(valid, nbr_idx, -1).reshape(-1)
    edge_index = jnp.stack([edge_i, edge_j], axis=0)

    w = jnp.take_along_axis(dist, nbr_idx, axis=1)
    edge_weight = jnp.where(valid, w, 0.0).reshape(-1)

    # TODO(synk): dynamic-size edge list (torch_cluster radius_graph) has no
    # static-shape Pallas/XLA equivalent; we emit a padded neighbor list instead.
    return edge_index, edge_weight, None, counts


if __name__ == "__main__":
    cutoff_lower = 0.0
    cutoff_upper = 5.0
    max_num_neighbors = 32

    key = jax.random.PRNGKey(0)
    n_atoms = 32                                     # 2 molecules x 16 atoms
    pos = jax.random.uniform(key, (n_atoms, 3), dtype=jnp.float32,
                             minval=0.0, maxval=6.0)
    batch = jnp.concatenate([
        jnp.zeros((16,), jnp.int32),
        jnp.ones((16,), jnp.int32),
    ])

    edge_index, edge_weight, edge_vec, counts = distance_forward(
        pos, batch,
        cutoff_lower=cutoff_lower,
        cutoff_upper=cutoff_upper,
        max_num_neighbors=max_num_neighbors,
    )
    jax.block_until_ready((edge_index, edge_weight, counts))

    # Same invariant the PyTorch module asserts.
    counts_np = np.asarray(counts)
    assert (counts_np <= max_num_neighbors).all(), (
        "The neighbor search missed some atoms due to max_num_neighbors being "
        "too low.")

    # Lightweight correctness check against a numpy reference.
    pos_np = np.asarray(pos)
    batch_np = np.asarray(batch)
    diff = pos_np[:, None, :] - pos_np[None, :, :]
    d_ref = np.sqrt((diff ** 2).sum(-1))
    adj_ref = ((batch_np[:, None] == batch_np[None, :])
               & (~np.eye(n_atoms, dtype=bool))
               & (d_ref <= cutoff_upper)
               & (d_ref >= cutoff_lower))
    assert (counts_np == adj_ref.sum(1)).all()
    ei = np.asarray(edge_index)
    ew = np.asarray(edge_weight)
    real = ei[0] >= 0
    assert (counts_np.sum() == real.sum())
    np.testing.assert_allclose(ew[real], d_ref[ei[0][real], ei[1][real]],
                               rtol=1e-5, atol=1e-5)

    print("KERNEL_OK")
</pallas_src>

<mosaic_0001>
module attributes {stable_mosaic.version = 11 : i64} {
  func.func @_distance_kernel(%arg0: i32, %arg1: i32, %arg2: memref<128x4xf32, #tpu.memory_space<vmem>>, %arg3: memref<4x128xf32, #tpu.memory_space<vmem>>, %arg4: memref<128x128xf32, #tpu.memory_space<vmem>>, %arg5: memref<128x1xf32, #tpu.memory_space<vmem>>) attributes {dimension_semantics = [#tpu.dimension_semantics<parallel>, #tpu.dimension_semantics<arbitrary>], iteration_bounds = array<i64: 1, 1>, scalar_prefetch = 0 : i64, scratch_operands = 0 : i64, tpu.core_type = #tpu.core_type<tc>, window_params = [{transform_indices = @transform_0, window_bounds = array<i64: 128, 4>}, {transform_indices = @transform_1, window_bounds = array<i64: 4, 128>}, {transform_indices = @transform_2, window_bounds = array<i64: 128, 128>}, {transform_indices = @transform_3, window_bounds = array<i64: 128, 1>}]} {
    %c0 = arith.constant 0 : index
    %c0_0 = arith.constant 0 : index
    %0 = vector.load %arg2[%c0, %c0_0] : memref<128x4xf32, #tpu.memory_space<vmem>>, vector<128x1xf32>
    %c0_1 = arith.constant 0 : index
    %c1 = arith.constant 1 : index
    %1 = vector.load %arg2[%c0_1, %c1] : memref<128x4xf32, #tpu.memory_space<vmem>>, vector<128x1xf32>
    %c0_2 = arith.constant 0 : index
    %c2 = arith.constant 2 : index
    %2 = vector.load %arg2[%c0_2, %c2] : memref<128x4xf32, #tpu.memory_space<vmem>>, vector<128x1xf32>
    %c0_3 = arith.constant 0 : index
    %c3 = arith.constant 3 : index
    %3 = vector.load %arg2[%c0_3, %c3] : memref<128x4xf32, #tpu.memory_space<vmem>>, vector<128x1xf32>
    %c0_4 = arith.constant 0 : index
    %c0_5 = arith.constant 0 : index
    %4 = vector.load %arg3[%c0_4, %c0_5] : memref<4x128xf32, #tpu.memory_space<vmem>>, vector<1x128xf32>
    %c1_6 = arith.constant 1 : index
    %c0_7 = arith.constant 0 : index
    %5 = vector.load %arg3[%c1_6, %c0_7] : memref<4x128xf32, #tpu.memory_space<vmem>>, vector<1x128xf32>
    %c2_8 = arith.constant 2 : index
    %c0_9 = arith.constant 0 : index
    %6 = vector.load %arg3[%c2_8, %c0_9] : memref<4x128xf32, #tpu.memory_space<vmem>>, vector<1x128xf32>
    %c3_10 = arith.constant 3 : index
    %c0_11 = arith.constant 0 : index
    %7 = vector.load %arg3[%c3_10, %c0_11] : memref<4x128xf32, #tpu.memory_space<vmem>>, vector<1x128xf32>
    %8 = vector.broadcast %0 : vector<128x1xf32> to vector<128x128xf32>
    %9 = vector.broadcast %4 : vector<1x128xf32> to vector<128x128xf32>
    %10 = arith.subf %8, %9 : vector<128x128xf32>
    %11 = vector.broadcast %1 : vector<128x1xf32> to vector<128x128xf32>
    %12 = vector.broadcast %5 : vector<1x128xf32> to vector<128x128xf32>
    %13 = arith.subf %11, %12 : vector<128x128xf32>
    %14 = vector.broadcast %2 : vector<128x1xf32> to vector<128x128xf32>
    %15 = vector.broadcast %6 : vector<1x128xf32> to vector<128x128xf32>
    %16 = arith.subf %14, %15 : vector<128x128xf32>
    %17 = arith.mulf %10, %10 : vector<128x128xf32>
    %18 = arith.mulf %13, %13 : vector<128x128xf32>
    %19 = arith.addf %17, %18 : vector<128x128xf32>
    %20 = arith.mulf %16, %16 : vector<128x128xf32>
    %21 = arith.addf %19, %20 : vector<128x128xf32>
    %22 = vector.broadcast %3 : vector<128x1xf32> to vector<128x128xf32>
    %23 = vector.broadcast %7 : vector<1x128xf32> to vector<128x128xf32>
    %24 = arith.cmpf oeq, %22, %23 : vector<128x128xf32>
    %cst = arith.constant 2.500000e+01 : f32
    %25 = vector.broadcast %cst : f32 to vector<128x128xf32>
    %26 = arith.cmpf ole, %21, %25 : vector<128x128xf32>
    %27 = arith.andi %24, %26 : vector<128x128xi1>
    %28 = math.sqrt %21 : vector<128x128xf32>
    %c0_i32 = arith.constant 0 : i32
    %29 = arith.cmpi eq, %arg1, %c0_i32 : i32
    %30 = arith.extui %29 : i1 to i32
    %c0_i32_12 = arith.constant 0 : i32
    %31 = arith.cmpi ne, %30, %c0_i32_12 : i32
    scf.if %31 {
      %cst_18 = arith.constant 0.000000e+00 : f32
      %44 = vector.broadcast %cst_18 : f32 to vector<128x1xf32>
      %c0_19 = arith.constant 0 : index
      %c0_20 = arith.constant 0 : index
      %45 = vector.load %arg5[%c0_19, %c0_20] : memref<128x1xf32, #tpu.memory_space<vmem>>, vector<128x1xf32>
      tpu.vector_store %arg5[%c0_19, %c0_20], %44 {strides = array<i32>} : memref<128x1xf32, #tpu.memory_space<vmem>>, vector<128x1xf32>,
    } else {
    }
    %c128_i32 = arith.constant 128 : i32
    %32 = arith.muli %arg0, %c128_i32 : i32
    %c128_i32_13 = arith.constant 128 : i32
    %33 = arith.muli %arg1, %c128_i32_13 : i32
    %c128_i32_14 = arith.constant 128 : i32
    %34 = arith.addi %33, %c128_i32_14 : i32
    %35 = arith.cmpi slt, %32, %34 : i32
    %c128_i32_15 = arith.constant 128 : i32
    %36 = arith.addi %32, %c128_i32_15 : i32
    %37 = arith.cmpi slt, %33, %36 : i32
    %38 = arith.andi %35, %37 : i1
    %39 = arith.extui %38 : i1 to i32
    %c0_i32_16 = arith.constant 0 : i32
    %40 = arith.cmpi ne, %39, %c0_i32_16 : i32
    scf.if %40 {
      %44 = tpu.iota {dimensions = array<i32: 0>} : vector<128x1xi32>
      %45 = vector.broadcast %32 : i32 to vector<128x1xi32>
      %46 = arith.addi %45, %44 : vector<128x1xi32>
      %47 = tpu.iota {dimensions = array<i32: 1>} : vector<1x128xi32>
      %48 = vector.broadcast %33 : i32 to vector<1x128xi32>
      %49 = arith.addi %48, %47 : vector<1x128xi32>
      %50 = vector.broadcast %46 : vector<128x1xi32> to vector<128x128xi32>
      %51 = vector.broadcast %49 : vector<1x128xi32> to vector<128x128xi32>
      %52 = arith.cmpi ne, %50, %51 : vector<128x128xi32>
      %53 = arith.andi %27, %52 : vector<128x128xi1>
      %cst_18 = arith.constant -1.000000e+00 : f32
      %54 = vector.broadcast %cst_18 : f32 to vector<128x128xf32>
      %55 = arith.select %53, %28, %54 : vector<128x128xi1>, vector<128x128xf32>
      %c0_19 = arith.constant 0 : index
      %c0_20 = arith.constant 0 : index
      %56 = vector.load %arg4[%c0_19, %c0_20] : memref<128x128xf32, #tpu.memory_space<vmem>>, vector<128x128xf32>
      tpu.vector_store %arg4[%c0_19, %c0_20], %55 {strides = array<i32>} : memref<128x128xf32, #tpu.memory_space<vmem>>, vector<128x128xf32>,
      %c0_21 = arith.constant 0 : index
      %c0_22 = arith.constant 0 : index
      %57 = vector.load %arg5[%c0_21, %c0_22] : memref<128x1xf32, #tpu.memory_space<vmem>>, vector<128x1xf32>
      %58 = arith.extui %53 : vector<128x128xi1> to vector<128x128xi32>
      %59 = arith.sitofp %58 : vector<128x128xi32> to vector<128x128xf32>
      %cst_23 = arith.constant dense<0.000000e+00> : vector<128xf32>
      %60 = vector.multi_reduction <add>, %59, %cst_23 [1] : vector<128x128xf32> to vector<128xf32>
      %61 = vector.shape_cast %60 : vector<128xf32> to vector<128x1xf32>
      %62 = arith.addf %57, %61 : vector<128x1xf32>
      %c0_24 = arith.constant 0 : index
      %c0_25 = arith.constant 0 : index
      %63 = vector.load %arg5[%c0_24, %c0_25] : memref<128x1xf32, #tpu.memory_space<vmem>>, vector<128x1xf32>
      tpu.vector_store %arg5[%c0_24, %c0_25], %62 {strides = array<i32>} : memref<128x1xf32, #tpu.memory_space<vmem>>, vector<128x1xf32>,
    } else {
    }
    %true = arith.constant true
    %41 = arith.xori %38, %true : i1
    %42 = arith.extui %41 : i1 to i32
    %c0_i32_17 = arith.constant 0 : i32
    %43 = arith.cmpi ne, %42, %c0_i32_17 : i32
    scf.if %43 {
      %cst_18 = arith.constant -1.000000e+00 : f32
      %44 = vector.broadcast %cst_18 : f32 to vector<128x128xf32>
      %45 = arith.select %27, %28, %44 : vector<128x128xi1>, vector<128x128xf32>
      %c0_19 = arith.constant 0 : index
      %c0_20 = arith.constant 0 : index
      %46 = vector.load %arg4[%c0_19, %c0_20] : memref<128x128xf32, #tpu.memory_space<vmem>>, vector<128x128xf32>
      tpu.vector_store %arg4[%c0_19, %c0_20], %45 {strides = array<i32>} : memref<128x128xf32, #tpu.memory_space<vmem>>, vector<128x128xf32>,
      %c0_21 = arith.constant 0 : index
      %c0_22 = arith.constant 0 : index
      %47 = vector.load %arg5[%c0_21, %c0_22] : memref<128x1xf32, #tpu.memory_space<vmem>>, vector<128x1xf32>
      %48 = arith.extui %27 : vector<128x128xi1> to vector<128x128xi32>
      %49 = arith.sitofp %48 : vector<128x128xi32> to vector<128x128xf32>
      %cst_23 = arith.constant dense<0.000000e+00> : vector<128xf32>
      %50 = vector.multi_reduction <add>, %49, %cst_23 [1] : vector<128x128xf32> to vector<128xf32>
      %51 = vector.shape_cast %50 : vector<128xf32> to vector<128x1xf32>
      %52 = arith.addf %47, %51 : vector<128x1xf32>
      %c0_24 = arith.constant 0 : index
      %c0_25 = arith.constant 0 : index
      %53 = vector.load %arg5[%c0_24, %c0_25] : memref<128x1xf32, #tpu.memory_space<vmem>>, vector<128x1xf32>
      tpu.vector_store %arg5[%c0_24, %c0_25], %52 {strides = array<i32>} : memref<128x1xf32, #tpu.memory_space<vmem>>, vector<128x1xf32>,
    } else {
    }
    return
  }
  func.func @transform_0(%arg0: i32, %arg1: i32) -> (i32, i32) {
    %c0_i32 = arith.constant 0 : i32
    %c0_i32_0 = arith.constant 0 : i32
    return %arg0, %c0_i32 : i32, i32
  }
  func.func @transform_1(%arg0: i32, %arg1: i32) -> (i32, i32) {
    %c0_i32 = arith.constant 0 : i32
    %c0_i32_0 = arith.constant 0 : i32
    return %c0_i32, %arg1 : i32, i32
  }
  func.func @transform_2(%arg0: i32, %arg1: i32) -> (i32, i32) {
    %c0_i32 = arith.constant 0 : i32
    return %arg0, %arg1 : i32, i32
  }
  func.func @transform_3(%arg0: i32, %arg1: i32) -> (i32, i32) {
    %c0_i32 = arith.constant 0 : i32
    %c0_i32_0 = arith.constant 0 : i32
    return %arg0, %c0_i32 : i32, i32
  }
}

</mosaic_0001>

<bundles_post_ra>
// kernel: tpu_custom_call.1
= control target key start
LH: loop header
LB: loop body
LE: loop exit
PB: predicated region body
PF: predicated region fallthrough
CT: control target
= control target key end

     0   :  { %v1132_v2 = vmov 0   ;;  %s2089_s0 = inlined_call_operand.vmem [shape: f32[128,4], index: 0, kind: input, shape index: {}]   ;;  %s2090_s1 = inlined_call_operand.vmem [shape: f32[4,128], index: 1, kind: input, shape index: {}]   ;;  %s2091_s2 = inlined_call_operand.hbm [shape: f32[128,128], index: 2, kind: output, shape index: {0}]   ;;  %s2092_s3 = inlined_call_operand.vmem [shape: f32[128,1], index: 3, kind: output, shape index: {1}]  }
   0x1   :  { %v1163_v0 = vld [vmem:[%s2089_s0 + $0x10] sm:$0xff]  ;;  %v1168_v1 = vld [vmem:[%s2089_s0] sm:$0xff]  ;;  %1069 = vset.pattern.permute.xlu1 %v1132_v2  ;;  %1068 = vset.pattern.permute.xlu0 %v1132_v2  ;;  %v1175_v3 = vld [vmem:[%s2089_s0 + $0x18] sm:$0xff] }
   0x2   :  { %46 = vperm.xlu1 %1069, %v1163_v0   ;;  %36 = vperm.xlu0 %1068, %v1168_v1   ;;  %v1180_v4 = vld [vmem:[%s2089_s0 + $0x8] sm:$0xff] }
   0x3   :  { %9 = vsyncpa [#allocation3], 0  ;;  %v1187_v5 = vld [vmem:[%s2089_s0 + $0x28] sm:$0xff]  ;;  %v1192_v6 = vld [vmem:[%s2089_s0 + $0x20] sm:$0xff]  ;;  %v1133_v17 = vmov 1   ;;  %v1134_v18 = vmov 2   ;;  %v641_v47 = vlaneseq }
   0x4   :  { %v1199_v7 = vld [vmem:[%s2089_s0 + $0x38] sm:$0xff]  ;;  %v1204_v8 = vld [vmem:[%s2089_s0 + $0x30] sm:$0xff]  ;;  %v1211_v9 = vld [vmem:[%s2089_s0 + $0x48] sm:$0xff]  ;;  %v1135_v19 = vmov 3   ;;  %vm2099_vm0 = vcmask 7168   ;;  %v2093_v26 = vmov 0.0  }
   0x5   :  { %v1216_v10 = vld [vmem:[%s2089_s0 + $0x40] sm:$0xff]  ;;  %v25_v11 = vld [vmem:[%s2089_s0 + $0x58] sm:$0xff]  ;;  %v1226_v12 = vld [vmem:[%s2089_s0 + $0x50] sm:$0xff]  ;;  %615 = vst.msk [vmem:[%s2092_s3] sm:$0xff] %vm2099_vm0, %v2093_v26  ;;  %v1384_v50 = vshrl.u32 %v641_v47, 7  ;;  %v1393_v54 = vand.u32 127, %v641_v47 }
   0x6   :  { %51 = vperm.xlu1 %1069, %v1175_v3   ;;  %41 = vperm.xlu0 %1068, %v1180_v4   ;;  %v27_v13 = vld [vmem:[%s2089_s0 + $0x68] sm:$0xff]  ;;  %v26_v14 = vld [vmem:[%s2089_s0 + $0x60] sm:$0xff]  ;;  %v29_v15 = vld [vmem:[%s2089_s0 + $0x78] sm:$0xff]  ;;  %616 = vst.msk [vmem:[%s2092_s3 + $0x8] sm:$0xff] %vm2099_vm0, %v2093_v26 }
   0x7   :  { %v28_v16 = vld [vmem:[%s2089_s0 + $0x70] sm:$0xff]  ;;  %617 = vst.msk [vmem:[%s2092_s3 + $0x10] sm:$0xff] %vm2099_vm0, %v2093_v26  ;;  %618 = vst.msk [vmem:[%s2092_s3 + $0x18] sm:$0xff] %vm2099_vm0, %v2093_v26  ;;  %v1024_v51 = vld [vmem:[%s2090_s1] ss:$0 sm:$0xff]  ;;  %v1396_v55 = vadd.s32 24, %v1384_v50  ;;  %vm679_vm1 = vcmp.ne.s32.totalorder %v1384_v50, %v1393_v54 }
   0x8   :  { %619 = vst.msk [vmem:[%s2092_s3 + $0x20] sm:$0xff] %vm2099_vm0, %v2093_v26  ;;  %620 = vst.msk [vmem:[%s2092_s3 + $0x28] sm:$0xff] %vm2099_vm0, %v2093_v26  ;;  %v1399_v56 = vadd.s32 8, %v1384_v50  ;;  %v1402_v57 = vadd.s32 40, %v1384_v50  ;;  %v1405_v58 = vadd.s32 16, %v1384_v50  ;;  %v1408_v59 = vadd.s32 56, %v1384_v50 }
   0x9   :  { %621 = vst.msk [vmem:[%s2092_s3 + $0x30] sm:$0xff] %vm2099_vm0, %v2093_v26  ;;  %622 = vst.msk [vmem:[%s2092_s3 + $0x38] sm:$0xff] %vm2099_vm0, %v2093_v26  ;;  %v1411_v60 = vadd.s32 32, %v1384_v50  ;;  %v1414_v63 = vadd.s32 72, %v1384_v50  ;;  %v1420_v2 = vadd.s32 88, %v1384_v50  ;;  %vm682_vm5 = vcmp.ne.s32.totalorder %v1396_v55, %v1393_v54 }
   0xa   :  { %61 = vperm.xlu1 %1069, %v1187_v5   ;;  %56 = vperm.xlu0 %1068, %v1192_v6   ;;  %623 = vst.msk [vmem:[%s2092_s3 + $0x40] sm:$0xff] %vm2099_vm0, %v2093_v26  ;;  %624 = vst.msk [vmem:[%s2092_s3 + $0x48] sm:$0xff] %vm2099_vm0, %v2093_v26 }
   0xb   :  { %625 = vst.msk [vmem:[%s2092_s3 + $0x50] sm:$0xff] %vm2099_vm0, %v2093_v26  ;;  %626 = vst.msk [vmem:[%s2092_s3 + $0x58] sm:$0xff] %vm2099_vm0, %v2093_v26 }
   0xc   :  { %627 = vst.msk [vmem:[%s2092_s3 + $0x60] sm:$0xff] %vm2099_vm0, %v2093_v26  ;;  %628 = vst.msk [vmem:[%s2092_s3 + $0x68] sm:$0xff] %vm2099_vm0, %v2093_v26 }
   0xd   :  { %629 = vst.msk [vmem:[%s2092_s3 + $0x70] sm:$0xff] %vm2099_vm0, %v2093_v26  ;;  %630 = vst.msk [vmem:[%s2092_s3 + $0x78] sm:$0xff] %vm2099_vm0, %v2093_v26 }
   0xe   :  { %71 = vperm.xlu1 %1069, %v1199_v7   ;;  %66 = vperm.xlu0 %1068, %v1204_v8  }
  0x12   :  { %81 = vperm.xlu1 %1069, %v1211_v9   ;;  %76 = vperm.xlu0 %1068, %v1216_v10  }
  0x16   :  { %91 = vperm.xlu1 %1069, %v25_v11   ;;  %86 = vperm.xlu0 %1068, %v1226_v12  }
  0x1a   :  { %101 = vperm.xlu1 %1069, %v27_v13   ;;  %96 = vperm.xlu0 %1068, %v26_v14  }
  0x1e   :  { %111 = vperm.xlu1 %1069, %v29_v15   ;;  %106 = vperm.xlu0 %1068, %v28_v16  }
  0x22   :  { %1071 = vset.pattern.permute.xlu1 %v1133_v17  ;;  %1070 = vset.pattern.permute.xlu0 %v1133_v17 }
  0x23   :  { %139 = vperm.xlu1 %1071, %v1180_v4   ;;  %135 = vperm.xlu0 %1070, %v1168_v1  }
  0x27   :  { %143 = vperm.xlu1 %1071, %v1163_v0   ;;  %147 = vperm.xlu0 %1070, %v1175_v3  }
  0x2b   :  { %151 = vperm.xlu1 %1071, %v1192_v6   ;;  %155 = vperm.xlu0 %1070, %v1187_v5  }
  0x2f   :  { %159 = vperm.xlu1 %1071, %v1204_v8   ;;  %163 = vperm.xlu0 %1070, %v1199_v7  }
  0x33   :  { %167 = vperm.xlu1 %1071, %v1216_v10   ;;  %171 = vperm.xlu0 %1070, %v1211_v9  }
  0x37   :  { %175 = vperm.xlu1 %1071, %v1226_v12   ;;  %179 = vperm.xlu0 %1070, %v25_v11  }
  0x3b   :  { %183 = vperm.xlu1 %1071, %v26_v14   ;;  %187 = vperm.xlu0 %1070, %v27_v13  }
  0x3f   :  { %191 = vperm.xlu1 %1071, %v28_v16   ;;  %195 = vperm.xlu0 %1070, %v29_v15  }
  0x43   :  { %1072 = vset.pattern.permute.xlu1 %v1134_v18  ;;  %1073 = vset.pattern.permute.xlu0 %v1134_v18  ;;  %v1447_v18 = vadd.s32 96, %v1384_v50 }
  0x44   :  { %219 = vperm.xlu1 %1072, %v1168_v1   ;;  %223 = vperm.xlu0 %1073, %v1180_v4  }
  0x45   :  { %2103 = vst [vmem:[#allocation8_spill] sm:$0xff] %v1447_v18 }
  0x48   :  { %227 = vperm.xlu1 %1072, %v1163_v0   ;;  %235 = vperm.xlu0 %1073, %v1192_v6  }
  0x4c   :  { %231 = vperm.xlu1 %1072, %v1175_v3   ;;  %243 = vperm.xlu0 %1073, %v1204_v8  }
  0x50   :  { %239 = vperm.xlu1 %1072, %v1187_v5   ;;  %251 = vperm.xlu0 %1073, %v1216_v10  }
  0x54   :  { %247 = vperm.xlu1 %1072, %v1199_v7   ;;  %259 = vperm.xlu0 %1073, %v1226_v12  }
  0x58   :  { %255 = vperm.xlu1 %1072, %v1211_v9   ;;  %267 = vperm.xlu0 %1073, %v26_v14  }
  0x5c   :  { %263 = vperm.xlu1 %1072, %v25_v11   ;;  %275 = vperm.xlu0 %1073, %v28_v16  }
  0x60   :  { %271 = vperm.xlu1 %1072, %v27_v13   ;;  %1074 = vset.pattern.permute.xlu0 %v1135_v19 }
  0x61   :  { %383 = vperm.xlu0 %1074, %v1168_v1  }
  0x64   :  { %279 = vperm.xlu1 %1072, %v29_v15  }
  0x65   :  { %395 = vperm.xlu0 %1074, %v1175_v3   ;;  %v1423_v3 = vadd.s32 64, %v1384_v50 }
  0x68   :  { %1075 = vset.pattern.permute.xlu1 %v1135_v19  ;;  %v1450_v19 = vadd.s32 112, %v1384_v50 }
  0x69   :  { %387 = vperm.xlu1 %1075, %v1180_v4   ;;  %403 = vperm.xlu0 %1074, %v1187_v5   ;;  %v1426_v4 = vadd.s32 104, %v1384_v50 }
  0x6a   :  { %2104 = vst [vmem:[#allocation9_spill] sm:$0xff] %v1450_v19 }
  0x6b   :  { %2100 = vst [vmem:[#allocation5_spill] sm:$0xff] %v1426_v4 }
  0x6d   :  { %391 = vperm.xlu1 %1075, %v1163_v0   ;;  %411 = vperm.xlu0 %1074, %v1199_v7   ;;  %v1417_v0 = vadd.s32 48, %v1384_v50 }
  0x71   :  { %399 = vperm.xlu1 %1075, %v1192_v6   ;;  %419 = vperm.xlu0 %1074, %v1211_v9   ;;  %v1434_v9 = vld [vmem:[%s2090_s1 + $0x1] ss:$0 sm:$0xff] }
  0x75   :  { %407 = vperm.xlu1 %1075, %v1204_v8   ;;  %427 = vperm.xlu0 %1074, %v25_v11  }
  0x79   :  { %415 = vperm.xlu1 %1075, %v1216_v10   ;;  %435 = vperm.xlu0 %1074, %v27_v13  }
  0x7d   :  { %423 = vperm.xlu1 %1075, %v1226_v12   ;;  %443 = vperm.xlu0 %1074, %v29_v15   ;;  %v1444_v15 = vadd.s32 120, %v1384_v50 }
  0x7f   :  { %2102 = vst [vmem:[#allocation7_spill] sm:$0xff] %v1444_v15 }
  0x81   :  { %v47_v20 = vpop.permute.xlu1 %46  ;;  %431 = vperm.xlu1 %1075, %v26_v14   ;;  %v37_v21 = vpop.permute.xlu0 %36  ;;  %v1441_v14 = vadd.s32 80, %v1384_v50 }
  0x82   :  { %v120_v61 = vsub.f32 %v47_v20, %v1024_v51  ;;  %v118_v62 = vsub.f32 %v37_v21, %v1024_v51 }
  0x83   :  { %2101 = vst [vmem:[#allocation6_spill] sm:$0xff] %v1441_v14 }
  0x84   :  { %v302_v17 = vmul.f32 %v118_v62, %v118_v62 }
  0x85   :  { %v52_v22 = vpop.permute.xlu1 %51  ;;  %439 = vperm.xlu1 %1075, %v28_v16   ;;  %v1274_v23 = vpop.permute.xlu0 %41  ;;  %v304_v16 = vmul.f32 %v120_v61, %v120_v61 }
  0x86   :  { %v121_v1 = vsub.f32 %v52_v22, %v1024_v51  ;;  %v119_v5 = vsub.f32 %v1274_v23, %v1024_v51 }
  0x88   :  { %v305_v20 = vmul.f32 %v121_v1, %v121_v1 }
  0x89   :  { %v1276_v24 = vpop.permute.xlu1 %61  ;;  %v1278_v25 = vpop.permute.xlu0 %56 }
  0x8a   :  { %v123_v6 = vsub.f32 %v1276_v24, %v1024_v51  ;;  %v122_v7 = vsub.f32 %v1278_v25, %v1024_v51  ;;  %v1456_v24 = vld [vmem:[%s2090_s1 + $0x2] ss:$0 sm:$0xff]  ;;  %v303_v25 = vmul.f32 %v119_v5, %v119_v5 }
  0x8d   :  { %v72_v27 = vpop.permute.xlu1 %71  ;;  %v67_v28 = vpop.permute.xlu0 %66 }
  0x8e   :  { %v125_v8 = vsub.f32 %v72_v27, %v1024_v51  ;;  %v124_v12 = vsub.f32 %v67_v28, %v1024_v51  ;;  %v307_v27 = vmul.f32 %v123_v6, %v123_v6  ;;  %v306_v28 = vmul.f32 %v122_v7, %v122_v7 }
  0x90   :  { %v308_v47 = vmul.f32 %v124_v12, %v124_v12 }
  0x91   :  { %v82_v29 = vpop.permute.xlu1 %81  ;;  %v77_v30 = vpop.permute.xlu0 %76 }
  0x92   :  { %v127_v13 = vsub.f32 %v82_v29, %v1024_v51  ;;  %v126_v21 = vsub.f32 %v77_v30, %v1024_v51  ;;  %v1458_v29 = vmul.f32 %v125_v8, %v125_v8 }
  0x94   :  { %v1460_v61 = vmul.f32 %v127_v13, %v127_v13  ;;  %v1468_v6 = vmul.f32 %v126_v21, %v126_v21 }
  0x95   :  { %v92_v31 = vpop.permute.xlu1 %91  ;;  %v1360_v32 = vpop.permute.xlu0 %86 }
  0x96   :  { %v129_v22 = vsub.f32 %v92_v31, %v1024_v51 }
  0x98   :  { %v1470_v7 = vmul.f32 %v129_v22, %v129_v22 }
  0x99   :  { %v1362_v33 = vpop.permute.xlu1 %101  ;;  %v1364_v34 = vpop.permute.xlu0 %96 }
  0x9a   :  { %v130_v12 = vsub.f32 %v1364_v34, %v1024_v51 }
  0x9d   :  { %v1366_v35 = vpop.permute.xlu1 %111  ;;  %v1368_v36 = vpop.permute.xlu0 %106 }
  0xa2   :  { %v140_v37 = vpop.permute.xlu1 %139  ;;  %v136_v38 = vpop.permute.xlu0 %135 }
  0xa3   :  { %v202_v23 = vsub.f32 %v136_v38, %v1434_v9  ;;  %v203_v62 = vsub.f32 %v140_v37, %v1434_v9  ;;  %v128_v38 = vsub.f32 %v1360_v32, %v1024_v51  ;;  %v133_v32 = vsub.f32 %v1366_v35, %v1024_v51 }
  0xa5   :  { %v318_v8 = vmul.f32 %v202_v23, %v202_v23  ;;  %v319_v13 = vmul.f32 %v203_v62, %v203_v62  ;;  %v1480_v23 = vmul.f32 %v128_v38, %v128_v38 }
  0xa6   :  { %v144_v39 = vpop.permute.xlu1 %143  ;;  %v148_v40 = vpop.permute.xlu0 %147 }
  0xa7   :  { %v204_v30 = vsub.f32 %v144_v39, %v1434_v9  ;;  %v205_v26 = vsub.f32 %v148_v40, %v1434_v9  ;;  %v131_v39 = vsub.f32 %v1362_v33, %v1024_v51  ;;  %v334_v14 = vadd.f32 %v318_v8, %v302_v17 }
  0xa8   :  { %v335_v38 = vadd.f32 %v319_v13, %v303_v25 }
  0xa9   :  { %v320_v21 = vmul.f32 %v204_v30, %v204_v30  ;;  %v321_v15 = vmul.f32 %v205_v26, %v205_v26  ;;  %v1486_v4 = vmul.f32 %v131_v39, %v131_v39 }
  0xaa   :  { %v152_v41 = vpop.permute.xlu1 %151  ;;  %v1370_v42 = vpop.permute.xlu0 %155 }
  0xab   :  { %v206_v19 = vsub.f32 %v152_v41, %v1434_v9  ;;  %v207_v37 = vsub.f32 %v1370_v42, %v1434_v9  ;;  %v132_v41 = vsub.f32 %v1368_v36, %v1024_v51  ;;  %v314_v36 = vmul.f32 %v130_v12, %v130_v12 }
  0xac   :  { %v1488_v51 = vmul.f32 %v133_v32, %v133_v32  ;;  %v336_v26 = vadd.f32 %v320_v21, %v304_v16 }
  0xad   :  { %v322_v42 = vmul.f32 %v206_v19, %v206_v19  ;;  %v323_v34 = vmul.f32 %v207_v37, %v207_v37  ;;  %v1490_v30 = vmul.f32 %v132_v41, %v132_v41 }
  0xae   :  { %v1372_v43 = vpop.permute.xlu1 %159  ;;  %v1374_v44 = vpop.permute.xlu0 %163 }
  0xaf   :  { %v208_v40 = vsub.f32 %v1372_v43, %v1434_v9  ;;  %v209_v35 = vsub.f32 %v1374_v44, %v1434_v9  ;;  %v338_v8 = vadd.f32 %v322_v42, %v306_v28 }
  0xb1   :  { %v324_v62 = vmul.f32 %v208_v40, %v208_v40  ;;  %v325_v39 = vmul.f32 %v209_v35, %v209_v35 }
  0xb2   :  { %v1376_v45 = vpop.permute.xlu1 %167  ;;  %v1378_v46 = vpop.permute.xlu0 %171 }
  0xb3   :  { %v210_v12 = vsub.f32 %v1376_v45, %v1434_v9  ;;  %v340_v40 = vadd.f32 %v324_v62, %v308_v47  ;;  %v211_v25 = vsub.f32 %v1378_v46, %v1434_v9 }
  0xb5   :  { %v327_v21 = vmul.f32 %v211_v25, %v211_v25 }
  0xb6   :  { %v1380_v48 = vpop.permute.xlu1 %175  ;;  %v1382_v49 = vpop.permute.xlu0 %179 }
  0xba   :  { %v1389_v52 = vpop.permute.xlu1 %183  ;;  %v1391_v53 = vpop.permute.xlu0 %187 }
  0xbb   :  { %v215_v45 = vsub.f32 %v1391_v53, %v1434_v9 }
  0xbe   :  { %v1436_v10 = vpop.permute.xlu1 %191  ;;  %v1438_v11 = vpop.permute.xlu0 %195 }
  0xc3   :  { %v220_v31 = vpop.permute.xlu1 %219  ;;  %v224_v1 = vpop.permute.xlu0 %223 }
  0xc4   :  { %v286_v5 = vsub.f32 %v220_v31, %v1456_v24  ;;  %v287_v33 = vsub.f32 %v224_v1, %v1456_v24 }
  0xc6   :  { %v350_v31 = vmul.f32 %v286_v5, %v286_v5  ;;  %v337_v5 = vadd.f32 %v321_v15, %v305_v20  ;;  %v351_v37 = vmul.f32 %v287_v33, %v287_v33  ;;  %v212_v15 = vsub.f32 %v1380_v48, %v1434_v9 }
  0xc7   :  { %v228_v22 = vpop.permute.xlu1 %227  ;;  %v236_v18 = vpop.permute.xlu0 %235  ;;  %v213_v20 = vsub.f32 %v1382_v49, %v1434_v9  ;;  %v326_v48 = vmul.f32 %v210_v12, %v210_v12  ;;  %v216_v49 = vsub.f32 %v1436_v10, %v1434_v9  ;;  %v343_v12 = vadd.f32 %v327_v21, %v1460_v61 }
  0xc8   :  { %v288_v43 = vsub.f32 %v228_v22, %v1456_v24  ;;  %v1492_v19 = vadd.f32 %v350_v31, %v334_v14  ;;  %v339_v22 = vadd.f32 %v323_v34, %v307_v27  ;;  %v290_v14 = vsub.f32 %v236_v18, %v1456_v24 }
  0xc9   :  { %v214_v27 = vsub.f32 %v1389_v52, %v1434_v9  ;;  %v1509_v46 = vadd.f32 %v351_v37, %v335_v38  ;;  %v217_v52 = vsub.f32 %v1438_v11, %v1434_v9  ;;  %v328_v33 = vmul.f32 %v212_v15, %v212_v15 }
  0xca   :  { %v352_v32 = vmul.f32 %v288_v43, %v288_v43  ;;  %1076 = vrsqrt.f32 %v1492_v19  ;;  %v354_v31 = vmul.f32 %v290_v14, %v290_v14  ;;  %v329_v34 = vmul.f32 %v213_v20, %v213_v20 }
  0xcb   :  { %v232_v1 = vpop.permute.xlu1 %231  ;;  %v244_v17 = vpop.permute.xlu0 %243  ;;  %v330_v35 = vmul.f32 %v214_v27, %v214_v27  ;;  %v331_v38 = vmul.f32 %v215_v45, %v215_v45  ;;  %v341_v9 = vadd.f32 %v325_v39, %v1458_v29  ;;  %v332_v11 = vmul.f32 %v216_v49, %v216_v49 }
  0xcc   :  { %v289_v44 = vsub.f32 %v232_v1, %v1456_v24  ;;  %v1518_v13 = vadd.f32 %v352_v32, %v336_v26  ;;  %v292_v42 = vsub.f32 %v244_v17, %v1456_v24  ;;  %v333_v26 = vmul.f32 %v217_v52, %v217_v52 }
  0xcd   :  { %v342_v17 = vadd.f32 %v326_v48, %v1468_v6  ;;  %v345_v32 = vadd.f32 %v329_v34, %v1470_v7  ;;  %v1536_v25 = vadd.f32 %v330_v35, %v314_v36  ;;  %v1539_v14 = vadd.f32 %v331_v38, %v1486_v4 }
  0xce   :  { %v353_v16 = vmul.f32 %v289_v44, %v289_v44  ;;  %v356_v37 = vmul.f32 %v292_v42, %v292_v42  ;;  %v1551_v7 = vadd.f32 %v333_v26, %v1488_v51  ;;  %vm466_vm2 = vcmp.le.f32.partialorder %v1492_v19, 25.0  ;;  %v1581_v42 = vld [vmem:[%s2090_s1 + $0x3] ss:$0 sm:$0xff]  ;;  %s1137_s1 = smov [#allocation2]  }
  0xcf   :  { %v240_v28 = vpop.permute.xlu1 %239  ;;  %v252_v41 = vpop.permute.xlu0 %251  ;;  %vm500_vm3 = vcmp.eq.f32.partialorder %v1492_v19, inf  ;;  %vm502_vm4 = vcmp.eq.f32.partialorder %v1492_v19, 0.0  ;;  %v503_v51 = vand.u32 2147483648, %v1492_v19  ;;  %vm507_vm6 = vcmp.eq.f32.partialorder %v1509_v46, inf  ;;  %s1009_s28 = sshll.u32 %s1137_s1, 4  ;;  %s1010_s28 = int_to_ptr.vmem [resolvable:$true] %s1009_s28 }
  0xd0   :  { %v1511_v18 = vadd.f32 %v353_v16, %v337_v5  ;;  %v291_v47 = vsub.f32 %v240_v28, %v1456_v24  ;;  %v1529_v5 = vadd.f32 %v354_v31, %v338_v8  ;;  %v294_v36 = vsub.f32 %v252_v41, %v1456_v24  ;;  %s1108_s29 = scalar_lea.vmem %s1010_s28, 2048  ;;  %p1113_p1 = scmp.lt.s32.totalorder %s1010_s28, %s1010_s28 }
  0xd1   :  { %v1555_v4 = vadd.f32 %v356_v37, %v340_v40  ;;  %v510_v41 = vand.u32 2147483648, %v1509_v46  ;;  %vm514_vm8 = vcmp.eq.f32.partialorder %v1518_v13, inf  ;;  %v517_v48 = vand.u32 2147483648, %v1518_v13  ;;  %p1109_p0 = scmp.ne.s32.totalorder %s1010_s28, %s1108_s29  ;;  %p1114_p2 = scmp.lt.s32.totalorder %s1108_s29, %s1108_s29 }
  0xd2   :  { %v355_v53 = vmul.f32 %v291_v47, %v291_v47  ;;  %1078 = vrsqrt.f32 %v1511_v18  ;;  %v358_v47 = vmul.f32 %v294_v36, %v294_v36  ;;  %vm469_vm7 = vcmp.le.f32.partialorder %v1511_v18, 25.0 }
  0xd3   :  { %v248_v43 = vpop.permute.xlu1 %247  ;;  %v260_v62 = vpop.permute.xlu0 %259  ;;  %1080 = vrsqrt.f32 %v1509_v46  ;;  %v531_v49 = vand.u32 2147483648, %v1529_v5  ;;  %vm521_vm9 = vcmp.eq.f32.partialorder %v1511_v18, inf  ;;  %vm523_vm10 = vcmp.eq.f32.partialorder %v1511_v18, 0.0  ;;  %p1115_p3 = por %p1114_p2, %p1113_p1 }
  0xd4   :  { %v1522_v1 = vadd.f32 %v355_v53, %v339_v22  ;;  %v293_v10 = vsub.f32 %v248_v43, %v1456_v24  ;;  %1082 = vrsqrt.f32 %v1518_v13  ;;  %v1533_v22 = vadd.f32 %v328_v33, %v1480_v23  ;;  %v1077_v61 = vpop.eup %1076 }
  0xd5   :  { %v1548_v23 = vadd.f32 %v332_v11, %v1490_v30  ;;  %v296_v15 = vsub.f32 %v260_v62, %v1456_v24  ;;  %v499_v28 = vmul.f32 %v1077_v61, %v1492_v19  ;;  %v524_v35 = vand.u32 2147483648, %v1511_v18  ;;  %p1116_p4 = pnand %p1115_p3, %p1109_p0 }
  0xd6   :  { %v357_v44 = vmul.f32 %v293_v10, %v293_v10  ;;  %1084 = vrsqrt.f32 %v1522_v1  ;;  %v1596_v11 = vadd.f32 %v358_v47, %v342_v17  ;;  %vm535_vm15 = vcmp.eq.f32.partialorder %v1522_v1, inf }
  0xd7   :  { %v256_v29 = vpop.permute.xlu1 %255  ;;  %v268_v39 = vpop.permute.xlu0 %267  ;;  %1086 = vrsqrt.f32 %v1529_v5  ;;  %v360_v33 = vmul.f32 %v296_v15, %v296_v15  ;;  %v501_v10 = vsel %vm500_vm3, %v1492_v19, %v499_v28  ;;  %vm516_vm0 = vcmp.eq.f32.partialorder %v1518_v13, 0.0 }
  0xd8   :  { %v1541_v16 = vadd.f32 %v357_v44, %v341_v9  ;;  %v295_v6 = vsub.f32 %v256_v29, %v1456_v24  ;;  %v298_v21 = vsub.f32 %v268_v39, %v1456_v24  ;;  %vm471_vm11 = vcmp.le.f32.partialorder %v1522_v1, 25.0 }
  0xd9   :  { %v538_v17 = vand.u32 2147483648, %v1522_v1  ;;  %vm528_vm14 = vcmp.eq.f32.partialorder %v1529_v5, inf  ;;  %v1614_v29 = vadd.f32 %v360_v33, %v1533_v22  ;;  %v545_v61 = vand.u32 2147483648, %v1555_v4 }
  0xda   :  { %v359_v8 = vmul.f32 %v295_v6, %v295_v6  ;;  %1088 = vrsqrt.f32 %v1541_v16  ;;  %v362_v44 = vmul.f32 %v298_v21, %v298_v21  ;;  %v504_v6 = vsel %vm502_vm4, %v503_v51, %v501_v10 }
  0xdb   :  { %v264_v20 = vpop.permute.xlu1 %263  ;;  %v1560_v27 = vpop.permute.xlu0 %275  ;;  %1090 = vrsqrt.f32 %v1555_v4  ;;  %v2105_v22 = vmov 0.0   ;;  %vm530_vm4 = vcmp.eq.f32.partialorder %v1529_v5, 0.0  ;;  %vm542_vm13 = vcmp.eq.f32.partialorder %v1555_v4, inf }
  0xdc   :  { %v1565_v30 = vadd.f32 %v359_v8, %v343_v12  ;;  %v297_v40 = vsub.f32 %v264_v20, %v1456_v24  ;;  %v1079_v45 = vpop.eup %1078  ;;  %v300_v47 = vsub.f32 %v1560_v27, %v1456_v24 }
  0xdd   :  { %v1081_v52 = vpop.eup %1080  ;;  %v520_v9 = vmul.f32 %v1079_v45, %v1511_v18  ;;  %v1639_v45 = vadd.f32 %v362_v44, %v1536_v25 }
  0xde   :  { %v361_v31 = vmul.f32 %v297_v40, %v297_v40  ;;  %v1083_v53 = vpop.eup %1082  ;;  %1092 = vrsqrt.f32 %v1565_v30  ;;  %v506_v26 = vmul.f32 %v1081_v52, %v1509_v46 }
  0xdf   :  { %v272_v34 = vpop.permute.xlu1 %271  ;;  %v522_v19 = vsel %vm521_vm9, %v1511_v18, %v520_v9 }
  0xe0   :  { %v1589_v43 = vadd.f32 %v361_v31, %v345_v32  ;;  %v299_v62 = vsub.f32 %v272_v34, %v1456_v24  ;;  %v384_v38 = vpop.permute.xlu0 %383  ;;  %v1085_v37 = vpop.eup %1084  ;;  %v513_v32 = vmul.f32 %v1083_v53, %v1518_v13  ;;  %v508_v50 = vsel %vm507_vm6, %v1509_v46, %v506_v26 }
  0xe1   :  { %vm450_vm12 = vcmp.eq.f32.partialorder %v384_v38, %v1581_v42  ;;  %v1087_v36 = vpop.eup %1086  ;;  %v534_v28 = vmul.f32 %v1085_v37, %v1522_v1  ;;  %vm473_vm6 = vcmp.le.f32.partialorder %v1541_v16, 25.0  ;;  %v525_v25 = vsel %vm523_vm10, %v524_v35, %v522_v19 }
  0xe2   :  { %v363_v12 = vmul.f32 %v299_v62, %v299_v62  ;;  %vm482_vm3 = vmand %vm450_vm12, %vm466_vm2  ;;  %vm537_vm12 = vcmp.eq.f32.partialorder %v1522_v1, 0.0  ;;  %1094 = vrsqrt.f32 %v1589_v43  ;;  %v515_v21 = vsel %vm514_vm8, %v1518_v13, %v513_v32 }
  0xe3   :  { %v280_v39 = vpop.permute.xlu1 %279  ;;  %vm695_vm2 = vmand %vm482_vm3, %vm679_vm1  ;;  %1096 = vrsqrt.f32 %v1596_v11  ;;  %vm2106_vm8 = vcmp.eq.f32.partialorder %v1509_v46, 0.0  ;;  %v536_v62 = vsel %vm535_vm15, %v1522_v1, %v534_v28  ;;  %v552_v38 = vand.u32 2147483648, %v1541_v16 }
  0xe4   :  { %v301_v8 = vsub.f32 %v280_v39, %v1456_v24  ;;  %v396_v15 = vpop.permute.xlu0 %395  ;;  %v1028_v20 = vsel %vm695_vm2, 1.0, %v2105_v22  ;;  %v711_v40 = vsel %vm695_vm2, %v504_v6, -1.0  ;;  %v1089_v51 = vpop.eup %1088  ;;  %vm549_vm2 = vcmp.eq.f32.partialorder %v1541_v16, inf }
  0xe5   :  { %vm453_vm1 = vcmp.eq.f32.partialorder %v396_v15, %v1581_v42  ;;  %791 = vadd.xlane.f32.xlu1 %v1028_v20  ;;  %727 = vst [vmem:[#allocation2] sm:$0xff] %v711_v40  ;;  %v1644_v52 = vadd.f32 %v363_v12, %v1539_v14  ;;  %v527_v14 = vmul.f32 %v1087_v36, %v1529_v5  ;;  %v1091_v27 = vpop.eup %1090 }
  0xe6   :  { %vm485_vm9 = vmand %vm453_vm1, %vm469_vm7  ;;  %v365_v24 = vmul.f32 %v301_v8, %v301_v8  ;;  %v511_v18 = vsel %vm2106_vm8, %v510_v41, %v508_v50  ;;  %v548_v55 = vmul.f32 %v1089_v51, %v1541_v16  ;;  %v364_v41 = vmul.f32 %v300_v47, %v300_v47 }
  0xe7   :  { %vm698_vm7 = vmand %vm485_vm9, %vm682_vm5  ;;  %vm2107_vm8 = vcmp.le.f32.partialorder %v1509_v46, 25.0  ;;  %vm475_vm1 = vcmp.le.f32.partialorder %v1565_v30, 25.0  ;;  %v518_v10 = vsel %vm516_vm0, %v517_v48, %v515_v21  ;;  %vm544_vm9 = vcmp.eq.f32.partialorder %v1555_v4, 0.0 }
  0xe8   :  { %v388_v31 = vpop.permute.xlu1 %387  ;;  %v404_v53 = vpop.permute.xlu0 %403  ;;  %v1031_v33 = vsel %vm698_vm7, 1.0, %v2105_v22  ;;  %v714_v34 = vsel %vm698_vm7, %v525_v25, -1.0  ;;  %1098 = vrsqrt.f32 %v1644_v52  ;;  %v1691_v9 = vadd.f32 %v365_v24, %v1551_v7  ;;  %v2125_v24 = vld [vmem:[#allocation5_spill] sm:$0xff] }
  0xe9   :  { %v1093_v35 = vpop.eup %1092  ;;  %vm451_vm5 = vcmp.eq.f32.partialorder %v388_v31, %v1581_v42  ;;  %vm455_vm10 = vcmp.eq.f32.partialorder %v404_v53, %v1581_v42  ;;  %797 = vadd.xlane.f32.xlu1 %v1031_v33  ;;  %730 = vst [vmem:[#allocation2 + $0x18] sm:$0xff] %v714_v34  ;;  %v529_v48 = vsel %vm528_vm14, %v1529_v5, %v527_v14  ;;  %vm563_vm0 = vcmp.eq.f32.partialorder %v1565_v30, inf }
  0xea   :  { %vm483_vm3 = vmand %vm451_vm5, %vm2107_vm8  ;;  %v541_v26 = vmul.f32 %v1091_v27, %v1555_v4  ;;  %vm2110_vm8 = vcmp.ne.s32.totalorder %v1399_v56, %v1393_v54  ;;  %v539_v12 = vsel %vm537_vm12, %v538_v17, %v536_v62  ;;  %v550_v32 = vsel %vm549_vm2, %v1541_v16, %v548_v55 }
  0xeb   :  { %vm1697_vm5 = vmand %vm455_vm10, %vm471_vm11  ;;  %v562_v39 = vmul.f32 %v1093_v35, %v1565_v30  ;;  %1100 = vrsqrt.f32 %v1614_v29  ;;  %vm2113_vm12 = vcmp.ne.s32.totalorder %v1402_v57, %v1393_v54  ;;  %vm472_vm2 = vcmp.le.f32.partialorder %v1555_v4, 25.0 }
  0xec   :  { %v392_v37 = vpop.permute.xlu1 %391  ;;  %v412_v44 = vpop.permute.xlu0 %411  ;;  %vm1709_vm15 = vmand %vm483_vm3, %vm2110_vm8  ;;  %vm685_vm10 = vcmp.ne.s32.totalorder %v1417_v0, %v1393_v54  ;;  %v1738_v17 = vadd.f32 %v364_v41, %v1548_v23  ;;  %vm2114_vm8 = vcmp.le.f32.partialorder %v1518_v13, 25.0  ;;  %v532_v13 = vsel %vm530_vm4, %v531_v49, %v529_v48  ;;  %v2133_v41 = vld [vmem:[#allocation7_spill] sm:$0xff] }
  0xed   :  { %v1095_v6 = vpop.eup %1094  ;;  %vm452_vm11 = vcmp.eq.f32.partialorder %v392_v37, %v1581_v42  ;;  %vm457_vm14 = vcmp.eq.f32.partialorder %v412_v44, %v1581_v42  ;;  %v1029_v56 = vsel %vm1709_vm15, 1.0, %v2105_v22  ;;  %v712_v1 = vsel %vm1709_vm15, %v511_v18, -1.0  ;;  %vm700_vm3 = vmand %vm1697_vm5, %vm2113_vm12 }
  0xee   :  { %vm1742_vm7 = vmand %vm452_vm11, %vm2114_vm8  ;;  %793 = vadd.xlane.f32.xlu0 %v1029_v56  ;;  %728 = vst [vmem:[#allocation2 + $0x8] sm:$0xff] %v712_v1  ;;  %v1033_v57 = vsel %vm700_vm3, 1.0, %v2105_v22  ;;  %v716_v8 = vsel %vm700_vm3, %v539_v12, -1.0  ;;  %vm565_vm15 = vcmp.eq.f32.partialorder %v1565_v30, 0.0  ;;  %vm477_vm11 = vcmp.le.f32.partialorder %v1589_v43, 25.0  ;;  %v1097_v50 = vpop.eup %1096  ;;  %v2136_v12 = vld [vmem:[#allocation8_spill] sm:$0xff] }
  0xef   :  { %vm1752_vm12 = vmand %vm457_vm14, %vm473_vm6  ;;  %801 = vadd.xlane.f32.xlu1 %v1033_v57  ;;  %732 = vst [vmem:[#allocation2 + $0x28] sm:$0xff] %v716_v8  ;;  %v543_v15 = vsel %vm542_vm13, %v1555_v4, %v541_v26  ;;  %1102 = vrsqrt.f32 %v1691_v9  ;;  %vm2119_vm6 = vcmp.ne.s32.totalorder %v1405_v58, %v1393_v54  ;;  %vm2120_vm3 = vcmp.eq.f32.partialorder %v1541_v16, 0.0 }
  0xf0   :  { %v400_v20 = vpop.permute.xlu1 %399  ;;  %v420_v40 = vpop.permute.xlu0 %419  ;;  %vm697_vm14 = vmand %vm1742_vm7, %vm2119_vm6  ;;  %v553_v19 = vsel %vm2120_vm3, %v552_v38, %v550_v32  ;;  %v564_v49 = vsel %vm563_vm0, %v1565_v30, %v562_v39  ;;  %v576_v51 = vmul.f32 %v1095_v6, %v1589_v43  ;;  %1104 = vrsqrt.f32 %v1639_v45 }
  0xf1   :  { %vm454_vm13 = vcmp.eq.f32.partialorder %v400_v20, %v1581_v42  ;;  %vm459_vm4 = vcmp.eq.f32.partialorder %v420_v40, %v1581_v42  ;;  %v713_v58 = vsel %vm697_vm14, %v518_v10, -1.0  ;;  %v1030_v28 = vsel %vm697_vm14, 1.0, %v2105_v22 }
  0xf2   :  { %vm2121_vm7 = vcmp.ne.s32.totalorder %v1408_v59, %v1393_v54  ;;  %vm474_vm0 = vcmp.le.f32.partialorder %v1596_v11, 25.0  ;;  %vm687_vm6 = vcmp.ne.s32.totalorder %v1423_v3, %v1393_v54  ;;  %vm2122_vm3 = vcmp.le.f32.partialorder %v1529_v5, 25.0  ;;  %729 = vst [vmem:[#allocation2 + $0x10] sm:$0xff] %v713_v58  ;;  %795 = vadd.xlane.f32.xlu0 %v1030_v28  ;;  %v1099_v14 = vpop.eup %1098 }
  0xf3   :  { %vm702_vm8 = vmand %vm1752_vm12, %vm2121_vm7  ;;  %v566_v59 = vand.u32 2147483648, %v1565_v30  ;;  %vm577_vm12 = vcmp.eq.f32.partialorder %v1589_v43, inf  ;;  %v546_v25 = vsel %vm544_vm9, %v545_v61, %v543_v15  ;;  %1106 = vrsqrt.f32 %v1738_v17 }
  0xf4   :  { %vm1790_vm5 = vmand %vm454_vm13, %vm2122_vm3  ;;  %v1035_v47 = vsel %vm702_vm8, 1.0, %v2105_v22  ;;  %v718_v21 = vsel %vm702_vm8, %v553_v19, -1.0  ;;  %vm479_vm13 = vcmp.le.f32.partialorder %v1644_v52, 25.0  ;;  %vm579_vm8 = vcmp.eq.f32.partialorder %v1589_v43, 0.0  ;;  %v408_v27 = vpop.permute.xlu1 %407  ;;  %v428_v31 = vpop.permute.xlu0 %427 }
  0xf5   :  { %vm1801_vm7 = vmand %vm459_vm4, %vm475_vm1  ;;  %805 = vadd.xlane.f32.xlu1 %v1035_v47  ;;  %734 = vst [vmem:[#allocation2 + $0x38] sm:$0xff] %v718_v21  ;;  %vm2128_vm1 = vcmp.ne.s32.totalorder %v1411_v60, %v1393_v54  ;;  %v567_v53 = vsel %vm565_vm15, %v566_v59, %v564_v49  ;;  %v578_v33 = vsel %vm577_vm12, %v1589_v43, %v576_v51  ;;  %v580_v61 = vand.u32 2147483648, %v1589_v43  ;;  %v2130_v60 = vld [vmem:[#allocation6_spill] sm:$0xff]  ;;  %v1101_v30 = vpop.eup %1100 }
  0xf6   :  { %vm699_vm4 = vmand %vm1790_vm5, %vm2128_vm1  ;;  %v555_v34 = vmul.f32 %v1097_v50, %v1596_v11  ;;  %vm456_vm9 = vcmp.eq.f32.partialorder %v408_v27, %v1581_v42  ;;  %vm461_vm3 = vcmp.eq.f32.partialorder %v428_v31, %v1581_v42  ;;  %vm2129_vm14 = vcmp.ne.s32.totalorder %v1414_v63, %v1393_v54 }
  0xf7   :  { %v1032_v18 = vsel %vm699_vm4, 1.0, %v2105_v22  ;;  %v715_v55 = vsel %vm699_vm4, %v532_v13, -1.0  ;;  %vm704_vm5 = vmand %vm1801_vm7, %vm2129_vm14  ;;  %vm476_vm15 = vcmp.le.f32.partialorder %v1614_v29, 25.0  ;;  %vm556_vm4 = vcmp.eq.f32.partialorder %v1596_v11, inf }
  0xf8   :  { %vm1835_vm1 = vmand %vm456_vm9, %vm472_vm2  ;;  %799 = vadd.xlane.f32.xlu0 %v1032_v18  ;;  %731 = vst [vmem:[#allocation2 + $0x20] sm:$0xff] %v715_v55  ;;  %v1037_v62 = vsel %vm704_vm5, 1.0, %v2105_v22  ;;  %v720_v63 = vsel %vm704_vm5, %v567_v53, -1.0  ;;  %v590_v38 = vmul.f32 %v1099_v14, %v1644_v52  ;;  %vm481_vm7 = vcmp.le.f32.partialorder %v1691_v9, 25.0  ;;  %v416_v46 = vpop.permute.xlu1 %415  ;;  %v436_v48 = vpop.permute.xlu0 %435  ;;  %v2149_v18 = vld [vmem:[#allocation9_spill] sm:$0xff] }
  0xf9   :  { %vm1848_vm2 = vmand %vm461_vm3, %vm477_vm11  ;;  %809 = vadd.xlane.f32.xlu1 %v1037_v62  ;;  %736 = vst [vmem:[#allocation2 + $0x48] sm:$0xff] %v720_v63  ;;  %vm558_vm9 = vcmp.eq.f32.partialorder %v1596_v11, 0.0  ;;  %v559_v10 = vand.u32 2147483648, %v1596_v11  ;;  %vm591_vm5 = vcmp.eq.f32.partialorder %v1644_v52, inf  ;;  %v581_v26 = vsel %vm579_vm8, %v580_v61, %v578_v33  ;;  %v1103_v32 = vpop.eup %1102 }
  0xfa   :  { %vm701_vm11 = vmand %vm1835_vm1, %vm685_vm10  ;;  %v557_v37 = vsel %vm556_vm4, %v1596_v11, %v555_v34  ;;  %v592_v44 = vsel %vm591_vm5, %v1644_v52, %v590_v38  ;;  %v569_v7 = vmul.f32 %v1101_v30, %v1614_v29  ;;  %vm691_vm3 = vcmp.ne.s32.totalorder %v2136_v12, %v1393_v54  ;;  %v1105_v43 = vpop.eup %1104 }
  0xfb   :  { %vm458_vm14 = vcmp.eq.f32.partialorder %v416_v46, %v1581_v42  ;;  %vm463_vm12 = vcmp.eq.f32.partialorder %v436_v48, %v1581_v42  ;;  %v1034_v0 = vsel %vm701_vm11, 1.0, %v2105_v22  ;;  %v717_v39 = vsel %vm701_vm11, %v546_v25, -1.0 }
  0xfc   :  { %vm2137_vm10 = vcmp.ne.s32.totalorder %v1420_v2, %v1393_v54  ;;  %vm1878_vm1 = vmand %vm458_vm14, %vm474_vm0  ;;  %803 = vadd.xlane.f32.xlu0 %v1034_v0  ;;  %733 = vst [vmem:[#allocation2 + $0x30] sm:$0xff] %v717_v39  ;;  %vm593_vm4 = vcmp.eq.f32.partialorder %v1644_v52, 0.0  ;;  %v594_v36 = vand.u32 2147483648, %v1644_v52  ;;  %vm478_vm0 = vcmp.le.f32.partialorder %v1639_v45, 25.0  ;;  %v424_v8 = vpop.permute.xlu1 %423  ;;  %v444_v23 = vpop.permute.xlu0 %443 }
  0xfd   :  { %vm706_vm8 = vmand %vm1848_vm2, %vm2137_vm10  ;;  %vm570_vm14 = vcmp.eq.f32.partialorder %v1614_v29, inf  ;;  %v604_v57 = vmul.f32 %v1103_v32, %v1691_v9  ;;  %vm605_vm2 = vcmp.eq.f32.partialorder %v1691_v9, inf  ;;  %v560_v13 = vsel %vm558_vm9, %v559_v10, %v557_v37  ;;  %v1107_v40 = vpop.eup %1106 }
  0xfe   :  { %v1039_v56 = vsel %vm706_vm8, 1.0, %v2105_v22  ;;  %v722_v1 = vsel %vm706_vm8, %v581_v26, -1.0  ;;  %vm1887_vm5 = vmand %vm463_vm12, %vm479_vm13  ;;  %v595_v52 = vsel %vm593_vm4, %v594_v36, %v592_v44  ;;  %v571_v15 = vsel %vm570_vm14, %v1614_v29, %v569_v7 }
  0xff   :  { %813 = vadd.xlane.f32.xlu1 %v1039_v56  ;;  %738 = vst [vmem:[#allocation2 + $0x58] sm:$0xff] %v722_v1  ;;  %vm703_vm13 = vmand %vm1878_vm1, %vm687_vm6  ;;  %v583_v20 = vmul.f32 %v1105_v43, %v1639_v45  ;;  %vm460_vm12 = vcmp.eq.f32.partialorder %v424_v8, %v1581_v42  ;;  %vm465_vm11 = vcmp.eq.f32.partialorder %v444_v23, %v1581_v42  ;;  %v573_v50 = vand.u32 2147483648, %v1614_v29 }
 0x100   :  { %v1036_v19 = vsel %vm703_vm13, 1.0, %v2105_v22  ;;  %v719_v11 = vsel %vm703_vm13, %v560_v13, -1.0  ;;  %vm2142_vm9 = vcmp.ne.s32.totalorder %v2125_v24, %v1393_v54  ;;  %vm1914_vm6 = vmand %vm460_vm12, %vm476_vm15  ;;  %v606_v58 = vsel %vm605_vm2, %v1691_v9, %v604_v57  ;;  %v432_v47 = vpop.permute.xlu1 %431 }
 0x101   :  { %vm708_vm10 = vmand %vm1887_vm5, %vm2142_vm9  ;;  %807 = vadd.xlane.f32.xlu0 %v1036_v19  ;;  %735 = vst [vmem:[#allocation2 + $0x40] sm:$0xff] %v719_v11  ;;  %vm572_vm15 = vcmp.eq.f32.partialorder %v1614_v29, 0.0  ;;  %vm607_vm1 = vcmp.eq.f32.partialorder %v1691_v9, 0.0  ;;  %v608_v16 = vand.u32 2147483648, %v1691_v9  ;;  %vm584_vm4 = vcmp.eq.f32.partialorder %v1639_v45, inf }
 0x102   :  { %v1041_v49 = vsel %vm708_vm10, 1.0, %v2105_v22  ;;  %v724_v51 = vsel %vm708_vm10, %v595_v52, -1.0  ;;  %vm1925_vm8 = vmand %vm465_vm11, %vm481_vm7  ;;  %v574_v21 = vsel %vm572_vm15, %v573_v50, %v571_v15  ;;  %vm2147_vm5 = vcmp.ne.s32.totalorder %v2130_v60, %v1393_v54 }
 0x103   :  { %817 = vadd.xlane.f32.xlu1 %v1041_v49  ;;  %740 = vst [vmem:[#allocation2 + $0x68] sm:$0xff] %v724_v51  ;;  %vm705_vm7 = vmand %vm1914_vm6, %vm2147_vm5  ;;  %v585_v59 = vsel %vm584_vm4, %v1639_v45, %v583_v20  ;;  %v587_v24 = vand.u32 2147483648, %v1639_v45  ;;  %v597_v29 = vmul.f32 %v1107_v40, %v1738_v17  ;;  %vm462_vm14 = vcmp.eq.f32.partialorder %v432_v47, %v1581_v42 }
 0x104   :  { %v1038_v9 = vsel %vm705_vm7, 1.0, %v2105_v22  ;;  %v721_v5 = vsel %vm705_vm7, %v574_v21, -1.0  ;;  %v609_v25 = vsel %vm607_vm1, %v608_v16, %v606_v58  ;;  %vm2148_vm2 = vcmp.ne.s32.totalorder %v2133_v41, %v1393_v54  ;;  %vm494_vm12 = vmand %vm462_vm14, %vm478_vm0  ;;  %v440_v53 = vpop.permute.xlu1 %439 }
 0x105   :  { %vm710_vm13 = vmand %vm1925_vm8, %vm2148_vm2  ;;  %811 = vadd.xlane.f32.xlu0 %v1038_v9  ;;  %737 = vst [vmem:[#allocation2 + $0x50] sm:$0xff] %v721_v5  ;;  %vm586_vm11 = vcmp.eq.f32.partialorder %v1639_v45, 0.0  ;;  %vm598_vm10 = vcmp.eq.f32.partialorder %v1738_v17, inf  ;;  %vm693_vm0 = vcmp.ne.s32.totalorder %v2149_v18, %v1393_v54  ;;  %vm464_vm6 = vcmp.eq.f32.partialorder %v440_v53, %v1581_v42 }
 0x106   :  { %v1043_v14 = vsel %vm710_vm13, 1.0, %v2105_v22  ;;  %v726_v27 = vsel %vm710_vm13, %v609_v25, -1.0  ;;  %v588_v31 = vsel %vm586_vm11, %v587_v24, %v585_v59  ;;  %vm707_vm9 = vmand %vm494_vm12, %vm691_vm3  ;;  %v599_v34 = vsel %vm598_vm10, %v1738_v17, %v597_v29 }
 0x107   :  { %821 = vadd.xlane.f32.xlu1 %v1043_v14  ;;  %742 = vst [vmem:[#allocation2 + $0x78] sm:$0xff] %v726_v27  ;;  %v1040_v33 = vsel %vm707_vm9, 1.0, %v2105_v22  ;;  %v723_v61 = vsel %vm707_vm9, %v588_v31, -1.0  ;;  %vm480_vm8 = vcmp.le.f32.partialorder %v1738_v17, 25.0  ;;  %v601_v45 = vand.u32 2147483648, %v1738_v17 }
 0x108   :  { %739 = vst [vmem:[#allocation2 + $0x60] sm:$0xff] %v723_v61  ;;  %vm496_vm15 = vmand %vm464_vm6, %vm480_vm8  ;;  %vm600_vm3 = vcmp.eq.f32.partialorder %v1738_v17, 0.0 }
 0x109   :  { %815 = vadd.xlane.f32.xlu0 %v1040_v33  ;;  %v602_v55 = vsel %vm600_vm3, %v601_v45, %v599_v34  ;;  %vm709_vm1 = vmand %vm496_vm15, %vm693_vm0 }
 0x10a   :  { %v1042_v60 = vsel %vm709_vm1, 1.0, %v2105_v22  ;;  %v725_v30 = vsel %vm709_vm1, %v602_v55, -1.0 }
 0x10b   :  { %741 = vst [vmem:[#allocation2 + $0x70] sm:$0xff] %v725_v30 }
 0x10d   :  { %819 = vadd.xlane.f32.xlu0 %v1042_v60 }
 0x10e   :  { %1119 = shalt.err (!%p1116_p4)
}
 0x10f   :  { %s1120_s5 = scalar_lea.hbm %s2091_s2, 2048 }
 0x110   :  { %p1121_p5 = scmp.ne.s32.totalorder %s2091_s2, %s1120_s5  ;;  %p1124_p6 = scmp.lt.u32.totalorder %s1120_s5, %s2091_s2 }
 0x112   :  { %p1126_p7 = pnand %p1124_p6, %p1121_p5 }
 0x114   :  { %1129 = shalt.err (!%p1126_p7)
}
 0x115   :  { %s1138_s10 = smov 128   ;;  %s1139_s11 = smov 8   ;;  %v743_v54 = vld [vmem:[%s2092_s3] sm:$0xff]  ;;  %v746_v17 = vld [vmem:[%s2092_s3 + $0x18] sm:$0xff]  ;;  %vm2150_vm4 = vcmask 7168   ;;  %v744_v63 = vld [vmem:[%s2092_s3 + $0x8] sm:$0xff] }
 0x116   :  { %1015 = dma.vmem_to_hbm [thread:$0]  %s1010_s28, 2048, %s2091_s2, [#allocation3], %s1138_s10, %s1138_s10, %s1139_s11   ;;  %vm2151_vm5 = vmmov %vm2150_vm4 }
 0x117   :  { %v748_v38 = vld [vmem:[%s2092_s3 + $0x28] sm:$0xff]  ;;  %v745_v48 = vld [vmem:[%s2092_s3 + $0x10] sm:$0xff]  ;;  %vm2152_vm7 = vmmov %vm2150_vm4 }
 0x118   :  { %v750_v26 = vld [vmem:[%s2092_s3 + $0x38] sm:$0xff]  ;;  %vm2153_vm14 = vmmov %vm2150_vm4  ;;  %v747_v32 = vld [vmem:[%s2092_s3 + $0x20] sm:$0xff] }
 0x119   :  { %vm2154_vm2 = vmmov %vm2150_vm4  ;;  %v752_v0 = vld [vmem:[%s2092_s3 + $0x48] sm:$0xff]  ;;  %v749_v1 = vld [vmem:[%s2092_s3 + $0x30] sm:$0xff] }
 0x11a   :  { %vm2155_vm13 = vmmov %vm2154_vm2  ;;  %v754_v36 = vld [vmem:[%s2092_s3 + $0x58] sm:$0xff]  ;;  %v751_v13 = vld [vmem:[%s2092_s3 + $0x40] sm:$0xff] }
 0x11b   :  { %vm2156_vm12 = vmmov %vm2154_vm2  ;;  %v756_v52 = vld [vmem:[%s2092_s3 + $0x68] sm:$0xff]  ;;  %v753_v11 = vld [vmem:[%s2092_s3 + $0x50] sm:$0xff] }
 0x11c   :  { %vm2157_vm11 = vmmov %vm2154_vm2  ;;  %v758_v3 = vld [vmem:[%s2092_s3 + $0x78] sm:$0xff]  ;;  %v755_v28 = vld [vmem:[%s2092_s3 + $0x60] sm:$0xff] }
 0x11d   :  { %vm2158_vm9 = vmmov %vm2154_vm2  ;;  %v757_v21 = vld [vmem:[%s2092_s3 + $0x70] sm:$0xff] }
 0x11e   :  { %vm2159_vm10 = vmmov %vm2154_vm2 }
 0x11f   :  { %vm2160_vm0 = vmmov %vm2154_vm2 }
 0x120   :  { %vm2161_vm6 = vmmov %vm2160_vm0 }
 0x121   :  { %vm2162_vm8 = vmmov %vm2160_vm0 }
 0x122   :  { %vm2163_vm15 = vmmov %vm2160_vm0 }
 0x123   :  { %vm2164_vm3 = vmmov %vm2160_vm0 }
 0x124   :  { %vm2165_vm1 = vmmov %vm2160_vm0 }
 0x172   :  { %v792_v42 = vpop.xlane.xlu1 %791 }
 0x173   :  { %v823_v22 = vadd.f32 %v792_v42, %v743_v54 }
 0x175   :  { %840 = vst.msk [vmem:[%s2092_s3] sm:$0xff] %vm2150_vm4, %v823_v22 }
 0x176   :  { %v798_v35 = vpop.xlane.xlu1 %797 }
 0x177   :  { %v826_v62 = vadd.f32 %v798_v35, %v746_v17 }
 0x179   :  { %843 = vst.msk [vmem:[%s2092_s3 + $0x18] sm:$0xff] %vm2151_vm5, %v826_v62 }
 0x17b   :  { %v794_v41 = vpop.xlane.xlu0 %793 }
 0x17c   :  { %v802_v4 = vpop.xlane.xlu1 %801  ;;  %v824_v10 = vadd.f32 %v794_v41, %v744_v63 }
 0x17d   :  { %v828_v46 = vadd.f32 %v802_v4, %v748_v38 }
 0x17e   :  { %841 = vst.msk [vmem:[%s2092_s3 + $0x8] sm:$0xff] %vm2152_vm7, %v824_v10 }
 0x17f   :  { %845 = vst.msk [vmem:[%s2092_s3 + $0x28] sm:$0xff] %vm2153_vm14, %v828_v46  ;;  %v796_v37 = vpop.xlane.xlu0 %795 }
 0x180   :  { %v825_v7 = vadd.f32 %v796_v37, %v745_v48 }
 0x182   :  { %v806_v44 = vpop.xlane.xlu1 %805  ;;  %842 = vst.msk [vmem:[%s2092_s3 + $0x10] sm:$0xff] %vm2154_vm2, %v825_v7 }
 0x183   :  { %v830_v12 = vadd.f32 %v806_v44, %v750_v26 }
 0x185   :  { %847 = vst.msk [vmem:[%s2092_s3 + $0x38] sm:$0xff] %vm2155_vm13, %v830_v12  ;;  %v800_v39 = vpop.xlane.xlu0 %799 }
 0x186   :  { %v810_v43 = vpop.xlane.xlu1 %809  ;;  %v827_v6 = vadd.f32 %v800_v39, %v747_v32 }
 0x187   :  { %v832_v56 = vadd.f32 %v810_v43, %v752_v0 }
 0x188   :  { %844 = vst.msk [vmem:[%s2092_s3 + $0x20] sm:$0xff] %vm2156_vm12, %v827_v6 }
 0x189   :  { %849 = vst.msk [vmem:[%s2092_s3 + $0x48] sm:$0xff] %vm2157_vm11, %v832_v56  ;;  %v804_v2 = vpop.xlane.xlu0 %803 }
 0x18a   :  { %v829_v8 = vadd.f32 %v804_v2, %v749_v1 }
 0x18c   :  { %v814_v57 = vpop.xlane.xlu1 %813  ;;  %846 = vst.msk [vmem:[%s2092_s3 + $0x30] sm:$0xff] %vm2158_vm9, %v829_v8 }
 0x18d   :  { %v834_v23 = vadd.f32 %v814_v57, %v754_v36 }
 0x18e   :  { %v808_v15 = vpop.xlane.xlu0 %807 }
 0x18f   :  { %851 = vst.msk [vmem:[%s2092_s3 + $0x58] sm:$0xff] %vm2159_vm10, %v834_v23  ;;  %v831_v40 = vadd.f32 %v808_v15, %v751_v13 }
 0x190   :  { %v818_v20 = vpop.xlane.xlu1 %817 }
 0x191   :  { %v836_v19 = vadd.f32 %v818_v20, %v756_v52  ;;  %848 = vst.msk [vmem:[%s2092_s3 + $0x40] sm:$0xff] %vm2160_vm0, %v831_v40 }
 0x192   :  { %v812_v49 = vpop.xlane.xlu0 %811 }
 0x193   :  { %853 = vst.msk [vmem:[%s2092_s3 + $0x68] sm:$0xff] %vm2161_vm6, %v836_v19  ;;  %v833_v50 = vadd.f32 %v812_v49, %v753_v11 }
 0x194   :  { %v822_v51 = vpop.xlane.xlu1 %821 }
 0x195   :  { %v838_v58 = vadd.f32 %v822_v51, %v758_v3  ;;  %850 = vst.msk [vmem:[%s2092_s3 + $0x50] sm:$0xff] %vm2162_vm8, %v833_v50 }
 0x196   :  { %v816_v16 = vpop.xlane.xlu0 %815 }
 0x197   :  { %855 = vst.msk [vmem:[%s2092_s3 + $0x78] sm:$0xff] %vm2163_vm15, %v838_v58  ;;  %v835_v47 = vadd.f32 %v816_v16, %v755_v28 }
 0x199   :  { %852 = vst.msk [vmem:[%s2092_s3 + $0x60] sm:$0xff] %vm2164_vm3, %v835_v47 }
 0x19a   :  { %v820_v59 = vpop.xlane.xlu0 %819 }
 0x19b   :  { %v837_v24 = vadd.f32 %v820_v59, %v757_v21 }
 0x19d   :  { %854 = vst.msk [vmem:[%s2092_s3 + $0x70] sm:$0xff] %vm2165_vm1, %v837_v24 }
 0x19e   :  { %1130 = dma.done.wait [#allocation3], 2048  }
 0x19f   :  { %1131 = vsyncadd [#allocation3], 4294965248 }
 0x1a0   :  { %1023 = vsyncpa [#allocation3], 1 }

</bundles_post_ra>
